<compile_context>
chip_gen: v6e
topology: v6e:2x2x1
jax: 0.10.0
libtpu: 0.0.40
codegen_flags: <defaults>
</compile_context>

<pallas_src>
import jax
import jax.numpy as jnp
from jax import lax
from jax.experimental import pallas as pl
from jax.experimental.pallas import tpu as pltpu

_LANE = 128
_SUBLANE = 8


def _round_up(x, m):
    return -(-x // m) * m


def _make_kernel(enc_len, block_batch):
    """Kernel closure for a fixed enc_len (node count) and batch block size."""
    n_nodes = enc_len + 1

    def kernel(t2n_ref, emb_ref, rand_ref, out_ref):
        e_l = emb_ref.shape[1]

        # Constants shared by every batch element of this block (hoisted).
        node_ids = lax.broadcasted_iota(jnp.int32, (n_nodes, e_l), 0)
        pad_row = lax.broadcasted_iota(jnp.int32, (n_nodes, 1), 0) == enc_len

        def one_batch(b):
            # token2node = where(token2node < 0, enc_len, token2node)
            t2n = t2n_ref[b]                                   # (1, E_L) int32
            t2n = jnp.where(t2n < 0, enc_len, t2n)

            hits = node_ids == t2n                             # (N, E_L) bool
            # scatter_add(dim=1) == one_hot @ token_embedding on the MXU
            # ({0,1} one-hot is exact in bf16; f32 accumulation).
            onehot = hits.astype(jnp.bfloat16)
            sums = jnp.dot(onehot, emb_ref[b],
                           preferred_element_type=jnp.float32)  # (N, H)
            # Token counts per node: XLU lane reduce (keeps the MXU free).
            counts = jnp.sum(hits.astype(jnp.float32), axis=1, keepdims=True)

            # wnode_embedding[:, enc_len, :] = 0.0  (padding-node row zeroed)
            sums = jnp.where(pad_row, 0.0, sums)
            # masked_fill(counts == 0, 1), then exact divide (PyTorch parity).
            counts = jnp.where(counts == 0.0, 1.0, counts)
            wemb = sums / counts

            # torch.rand_like replacement: wrapper-supplied uniform [0, 1).
            rnd = rand_ref[b].astype(jnp.float32)
            out_ref[b] = jnp.where(wemb == 0.0, rnd, wemb).astype(out_ref.dtype)

        if block_batch <= 8:
            # Small block: full unroll, only one (N, E_L) slab live at a time.
            for b in range(block_batch):
                one_batch(b)
        else:
            # Large block: fori_loop bounds vreg live ranges / code size.
            def body(b, carry):
                one_batch(b)
                return carry
            lax.fori_loop(0, block_batch, body, 0, unroll=2)

    return kernel


def _vmem_budget_and_limit():
    """Generation-aware VMEM budget (v5e/v6e: 128 MiB, v7x: 64 MiB per TC)."""
    cap = 64 * 1024 * 1024  # conservative default (v7x per-core)
    try:
        info = pltpu.get_tpu_info()
        cap = int(getattr(info, "vmem_capacity_bytes", cap)) or cap
    except Exception:
        pass
    budget = cap // 3        # ~42 MiB on v5e/v6e, ~21 MiB on v7x
    limit = (3 * cap) // 4   # ~96 MiB on v5e/v6e, ~48 MiB on v7x
    return budget, limit


def _choose_block_batch(b, e_l, h_pad, n_nodes, vmem_budget, min_steps=4):
    """Largest Bt whose (double-buffered, headroom-padded) block footprint fits
    the budget while leaving >= min_steps grid steps (>= 2 per TC on v7x)."""
    el_bf16 = _round_up(e_l, 16)              # bf16 sublane packing
    el_lane = _round_up(e_l, _LANE)
    nn_sub = _round_up(n_nodes, _SUBLANE)
    per_batch = (2 * el_bf16 * h_pad          # token_embedding tile (bf16)
                 + 2 * nn_sub * h_pad         # rand tile (bf16)
                 + 4 * nn_sub * h_pad         # output tile (f32)
                 + 4 * _SUBLANE * el_lane)    # token2node tile (int32, padded)
    fixed = 4 * (nn_sub * el_lane             # one-hot / hits slab
                 + 4 * nn_sub * h_pad)        # sums/counts/wemb/rnd f32 temps
    min_steps = max(1, min(min_steps, b))
    best = 1
    for bt in range(1, b + 1):
        if -(-b // bt) < min_steps:           # cdiv(b, bt) monotone in bt
            break
        # 2x double-buffered pipeline buffers * 1.5x headroom = 3x.
        if 3 * bt * per_batch + fixed > vmem_budget:
            continue
        best = bt
    return best


def graph_embedding_forward(token_embedding, token2node, enc_len, *,
                            rng_key=None, block_batch=None):
    """
    token_embedding: (B, E_L, H) float (bf16 preferred — it is the dominant
                     HBM read and is fed to the kernel unconverted)
    token2node:      (B, E_L) int (negatives mark padding tokens)
    returns:         (B, enc_len+1, H) float32 word-node embeddings
    """
    b, e_l, h = token_embedding.shape
    n_nodes = enc_len + 1

    # Dominant HBM read in bf16 (supply bf16 from the producer to avoid an
    # extra conversion pass over HBM).
    emb = (token_embedding if token_embedding.dtype == jnp.bfloat16
           else token_embedding.astype(jnp.bfloat16))

    # Lane-dense output stores: pad d_model to a multiple of 128 if needed
    # (no-op for real configs where d_model % 128 == 0).
    h_pad = _round_up(h, _LANE)
    if h_pad != h:
        emb = jnp.pad(emb, ((0, 0), (0, 0), (0, h_pad - h)))

    vmem_budget, vmem_limit = _vmem_budget_and_limit()
    if block_batch is None:
        block_batch = _choose_block_batch(b, e_l, h_pad, n_nodes, vmem_budget)

    # Non-divisor batch sizes: pad B up to a whole number of grid steps.
    steps = -(-b // block_batch)
    b_pad = steps * block_batch
    t2n = token2node.astype(jnp.int32)
    if b_pad != b:
        emb = jnp.pad(emb, ((0, b_pad - b), (0, 0), (0, 0)))
        t2n = jnp.pad(t2n, ((0, b_pad - b), (0, 0)), constant_values=-1)
    # (B, 1, E_L): block's last two dims equal the full array dims.
    t2n3 = t2n.reshape(b_pad, 1, e_l)

    # torch.rand_like replacement: uniform [0, 1) fill values generated once in
    # the wrapper (bf16: half the HBM traffic of f32; exact values irrelevant).
    if rng_key is None:
        rng_key = jax.random.PRNGKey(0)
    rand = jax.random.uniform(rng_key, (b_pad, n_nodes, h_pad),
                              dtype=jnp.bfloat16)

    kernel = _make_kernel(enc_len, block_batch)
    out = pl.pallas_call(
        kernel,
        out_shape=jax.ShapeDtypeStruct((b_pad, n_nodes, h_pad), jnp.float32),
        grid=(steps,),
        in_specs=[
            pl.BlockSpec((block_batch, 1, e_l), lambda i: (i, 0, 0)),
            pl.BlockSpec((block_batch, e_l, h_pad), lambda i: (i, 0, 0)),
            pl.BlockSpec((block_batch, n_nodes, h_pad), lambda i: (i, 0, 0)),
        ],
        out_specs=pl.BlockSpec((block_batch, n_nodes, h_pad),
                               lambda i: (i, 0, 0)),
        compiler_params=pltpu.CompilerParams(
            dimension_semantics=("parallel",),
            vmem_limit_bytes=vmem_limit,
        ),
    )(t2n3, emb, rand)

    if b_pad != b:
        out = out[:b]
    if h_pad != h:
        out = out[:, :, :h]
    return out


def _reference_wemb(token_embedding, token2node, enc_len):
    """Pure-JAX mirror of the PyTorch math up to (not including) the random
    fill of exactly-zero entries; same input precision as the kernel."""
    n_nodes = enc_len + 1
    t2n = jnp.where(token2node < 0, enc_len, token2node)
    onehot = jax.nn.one_hot(t2n, n_nodes, dtype=token_embedding.dtype)
    sums = jnp.einsum("ben,beh->bnh", onehot, token_embedding,
                      preferred_element_type=jnp.float32)          # (B, N, H)
    counts = jnp.sum(onehot.astype(jnp.float32), axis=1)[..., None]
    sums = sums.at[:, enc_len, :].set(0.0)
    counts = jnp.where(counts == 0.0, 1.0, counts)
    return sums / counts


if __name__ == "__main__":
    # Small config consistent with the module: d_model multiple of 128 so the
    # output last dim is lane-dense; B=4 gives >= 4 grid steps (2 per TC).
    B, E_L, H = 4, 16, 128
    ENC_LEN = 8                      # cfg.enc_len
    N = ENC_LEN + 1

    key = jax.random.PRNGKey(0)
    k_emb, k_map, k_fill = jax.random.split(key, 3)
    # Producer supplies bf16 activations (dominant HBM read of the kernel).
    token_embedding = jax.random.normal(
        k_emb, (B, E_L, H), dtype=jnp.float32).astype(jnp.bfloat16)
    # token2node in [-1, ENC_LEN): -1 marks padding tokens.
    token2node = jax.random.randint(k_map, (B, E_L), -1, ENC_LEN,
                                    dtype=jnp.int32)

    out = graph_embedding_forward(token_embedding, token2node, ENC_LEN,
                                  rng_key=k_fill)
    out = jax.block_until_ready(out)
    assert out.shape == (B, N, H)
    assert out.dtype == jnp.float32

    # Deterministic part of the output (pre random fill), same bf16-in /
    # f32-accumulate precision as the kernel.
    ref = _reference_wemb(token_embedding, token2node, ENC_LEN)
    nonzero = ref != 0.0
    err_ok = jnp.abs(out - ref) <= (1e-2 + 1e-2 * jnp.abs(ref))
    assert bool(jnp.all(jnp.where(nonzero, err_ok, True))), "value mismatch"
    # Exactly-zero entries (unused nodes / padding node row) must be filled
    # with uniform [0, 1) randoms.
    in_range = (out >= 0.0) & (out < 1.0)
    assert bool(jnp.all(jnp.where(nonzero, True, in_range))), \
        "random fill out of [0, 1)"

    # TODO(synk): dgl.unbatch/dgl.batch and per-graph ndata['feat'] assignment
    # have no Pallas/JAX tensor equivalent; the dense (B, enc_len+1, d_model)
    # node-embedding tensor is returned instead.
    print("KERNEL_OK")
</pallas_src>

<mosaic_0001>
module attributes {stable_mosaic.version = 11 : i64} {
  func.func @kernel(%arg0: i32, %arg1: memref<1x1x16xi32, #tpu.memory_space<vmem>>, %arg2: memref<1x16x128xbf16, #tpu.memory_space<vmem>>, %arg3: memref<1x9x128xbf16, #tpu.memory_space<vmem>>, %arg4: memref<1x9x128xf32, #tpu.memory_space<vmem>>) attributes {dimension_semantics = [#tpu.dimension_semantics<parallel>], iteration_bounds = array<i64: 4>, scalar_prefetch = 0 : i64, scratch_operands = 0 : i64, tpu.core_type = #tpu.core_type<tc>, window_params = [{transform_indices = @transform_0, window_bounds = array<i64: 1, 1, 16>}, {transform_indices = @transform_1, window_bounds = array<i64: 1, 16, 128>}, {transform_indices = @transform_2, window_bounds = array<i64: 1, 9, 128>}, {transform_indices = @transform_3, window_bounds = array<i64: 1, 9, 128>}]} {
    %0 = tpu.iota {dimensions = array<i32: 0>} : vector<9x16xi32>
    %1 = tpu.iota {dimensions = array<i32: 0>} : vector<9x1xi32>
    %c8_i32 = arith.constant 8 : i32
    %2 = vector.broadcast %c8_i32 : i32 to vector<9x1xi32>
    %3 = arith.cmpi eq, %1, %2 : vector<9x1xi32>
    %c0 = arith.constant 0 : index
    %c0_0 = arith.constant 0 : index
    %c0_1 = arith.constant 0 : index
    %4 = vector.load %arg1[%c0, %c0_0, %c0_1] : memref<1x1x16xi32, #tpu.memory_space<vmem>>, vector<1x1x16xi32>
    %5 = vector.shape_cast %4 : vector<1x1x16xi32> to vector<1x16xi32>
    %c0_i32 = arith.constant 0 : i32
    %6 = vector.broadcast %c0_i32 : i32 to vector<1x16xi32>
    %7 = arith.cmpi slt, %5, %6 : vector<1x16xi32>
    %c8_i32_2 = arith.constant 8 : i32
    %8 = vector.broadcast %c8_i32_2 : i32 to vector<1x16xi32>
    %9 = arith.select %7, %8, %5 : vector<1x16xi1>, vector<1x16xi32>
    %10 = vector.broadcast %9 : vector<1x16xi32> to vector<9x16xi32>
    %11 = arith.cmpi eq, %0, %10 : vector<9x16xi32>
    %12 = arith.extui %11 : vector<9x16xi1> to vector<9x16xi32>
    %13 = arith.sitofp %12 : vector<9x16xi32> to vector<9x16xf32>
    %14 = arith.truncf %13 : vector<9x16xf32> to vector<9x16xbf16>
    %c0_3 = arith.constant 0 : index
    %c0_4 = arith.constant 0 : index
    %c0_5 = arith.constant 0 : index
    %15 = vector.load %arg2[%c0_3, %c0_4, %c0_5] : memref<1x16x128xbf16, #tpu.memory_space<vmem>>, vector<1x16x128xbf16>
    %16 = vector.shape_cast %15 : vector<1x16x128xbf16> to vector<16x128xbf16>
    %cst = arith.constant dense<0.000000e+00> : vector<9x128xf32>
    %17 = tpu.matmul %14, %16, %cst {dimension_numbers = #tpu.dot_dimension_numbers<[1], [0], [0], [1], [0, 0, 1, 1], [], []>} : vector<9x16xbf16>, vector<16x128xbf16>, vector<9x128xf32> -> vector<9x128xf32>
    %18 = arith.extui %11 : vector<9x16xi1> to vector<9x16xi32>
    %19 = arith.sitofp %18 : vector<9x16xi32> to vector<9x16xf32>
    %cst_6 = arith.constant dense<0.000000e+00> : vector<9xf32>
    %20 = vector.multi_reduction <add>, %19, %cst_6 [1] : vector<9x16xf32> to vector<9xf32>
    %21 = vector.shape_cast %20 : vector<9xf32> to vector<9x1xf32>
    %cst_7 = arith.constant 0.000000e+00 : f32
    %22 = vector.shape_cast %3 : vector<9x1xi1> to vector<9x1xi1>
    %23 = vector.broadcast %22 : vector<9x1xi1> to vector<9x128xi1>
    %24 = vector.broadcast %cst_7 : f32 to vector<9x128xf32>
    %25 = arith.select %23, %24, %17 : vector<9x128xi1>, vector<9x128xf32>
    %cst_8 = arith.constant 0.000000e+00 : f32
    %26 = vector.broadcast %cst_8 : f32 to vector<9x1xf32>
    %27 = arith.cmpf oeq, %21, %26 : vector<9x1xf32>
    %cst_9 = arith.constant 1.000000e+00 : f32
    %28 = vector.broadcast %cst_9 : f32 to vector<9x1xf32>
    %29 = arith.select %27, %28, %21 : vector<9x1xi1>, vector<9x1xf32>
    %30 = vector.broadcast %29 : vector<9x1xf32> to vector<9x128xf32>
    %31 = arith.divf %25, %30 : vector<9x128xf32>
    %c0_10 = arith.constant 0 : index
    %c0_11 = arith.constant 0 : index
    %c0_12 = arith.constant 0 : index
    %32 = vector.load %arg3[%c0_10, %c0_11, %c0_12] : memref<1x9x128xbf16, #tpu.memory_space<vmem>>, vector<1x9x128xbf16>
    %33 = vector.shape_cast %32 : vector<1x9x128xbf16> to vector<9x128xbf16>
    %34 = arith.extf %33 : vector<9x128xbf16> to vector<9x128xf32>
    %cst_13 = arith.constant 0.000000e+00 : f32
    %35 = vector.broadcast %cst_13 : f32 to vector<9x128xf32>
    %36 = arith.cmpf oeq, %31, %35 : vector<9x128xf32>
    %37 = arith.select %36, %34, %31 : vector<9x128xi1>, vector<9x128xf32>
    %c0_14 = arith.constant 0 : index
    %c0_15 = arith.constant 0 : index
    %c0_16 = arith.constant 0 : index
    %38 = vector.load %arg4[%c0_14, %c0_15, %c0_16] : memref<1x9x128xf32, #tpu.memory_space<vmem>>, vector<1x9x128xf32>
    %39 = vector.shape_cast %38 : vector<1x9x128xf32> to vector<9x128xf32>
    %40 = vector.shape_cast %37 : vector<9x128xf32> to vector<1x9x128xf32>
    tpu.vector_store %arg4[%c0_14, %c0_15, %c0_16], %40 {strides = array<i32>} : memref<1x9x128xf32, #tpu.memory_space<vmem>>, vector<1x9x128xf32>,
    return
  }
  func.func @transform_0(%arg0: i32) -> (i32, i32, i32) {
    %c0_i32 = arith.constant 0 : i32
    %c0_i32_0 = arith.constant 0 : i32
    %c0_i32_1 = arith.constant 0 : i32
    return %arg0, %c0_i32, %c0_i32_0 : i32, i32, i32
  }
  func.func @transform_1(%arg0: i32) -> (i32, i32, i32) {
    %c0_i32 = arith.constant 0 : i32
    %c0_i32_0 = arith.constant 0 : i32
    %c0_i32_1 = arith.constant 0 : i32
    return %arg0, %c0_i32, %c0_i32_0 : i32, i32, i32
  }
  func.func @transform_2(%arg0: i32) -> (i32, i32, i32) {
    %c0_i32 = arith.constant 0 : i32
    %c0_i32_0 = arith.constant 0 : i32
    %c0_i32_1 = arith.constant 0 : i32
    return %arg0, %c0_i32, %c0_i32_0 : i32, i32, i32
  }
  func.func @transform_3(%arg0: i32) -> (i32, i32, i32) {
    %c0_i32 = arith.constant 0 : i32
    %c0_i32_0 = arith.constant 0 : i32
    %c0_i32_1 = arith.constant 0 : i32
    return %arg0, %c0_i32, %c0_i32_0 : i32, i32, i32
  }
}

</mosaic_0001>

<bundles_post_ra>
// kernel: tpu_custom_call.1
= control target key start
LH: loop header
LB: loop body
LE: loop exit
PB: predicated region body
PF: predicated region fallthrough
CT: control target
= control target key end

     0   :  { %s458_s12 = smov 0   ;;  %s490_s0 = inlined_call_operand.vmem [shape: s32[4,1,16], index: 0, kind: input, shape index: {}]   ;;  %s491_s1 = inlined_call_operand.vmem [shape: bf16[4,16,128], index: 1, kind: input, shape index: {}]   ;;  %s492_s2 = inlined_call_operand.vmem [shape: bf16[4,9,128], index: 2, kind: input, shape index: {}]   ;;  %s493_s3 = inlined_call_operand.vmem [shape: f32[4,9,128], index: 3, kind: output, shape index: {}]  }
   0x1 LB: > { %s385_s13 = sadd.s32 4294967295, %s434_s12   ;;  %p389_p0 = scmp.ge.s32.totalorder %s434_s12, 1  ;;  %s434_s12 = sphi %s458_s12, %s13_s12  }
   0x2   : > { %p155_p1 = scmp.lt.s32.totalorder %s434_s12, 5 }
   0x4   : > { %p156_p2 = pnand %p389_p0, %p155_p1 }
   0x5   : > { %p187_p3 = scmp.lt.s32.totalorder (!%p156_p2), %s385_s13, 3 }
   0x6   : > { %159 = sbr.rel (%p156_p2) target bundleno = 226 (0xe2), region = 32 }
   0xb   : > { %v206_v0 = vlaneseq  ;;  %v436_v1 = vmov 0.0   ;;  %vm437_vm0 = vmmov 0   ;;  %s495_s13 = smov (!%p187_p3, %s385_s13), 3  ;;  %vm233_vm4 = vcmask 130048  }
   0xc   : > { %407 = vmatprep.subr.bf16.mxu0 %v436_v1  ;;  %409 = vmatprep.mubr.msk.bf16.mxu0 %vm437_vm0, %v436_v1  ;;  %s189_s16 = scalar_lea.vmem %s490_s0, %s495_s13  ;;  %s402_s17 = sshll.u32 %s495_s13, 3  ;;  %vm281_vm5 = vcmask 122880  }
   0xd   : > { %v207_v2 = vshrl.u32 %v206_v0, 7  ;;  %v211_v5 = vld [vmem:[%s189_s16] sm:$0x1]  ;;  %s194_s20 = scalar_lea.vmem %s491_s1, %s402_s17  ;;  %s199_s23 = scalar_lea.vmem %s492_s2, %s402_s17 }
   0xe   : > { %vm212_vm1 = vcmp.lt.s32.totalorder %v211_v5, 0  ;;  %v423_v6 = vld [vmem:[%s194_s20] sm:$0xff]   ;;  %s404_s24 = sshll.u32 %s495_s13, 4 }
   0xf   : > { %v216_v3 = vsub.s32 0, %v207_v2  ;;  %v208_v4 = vadd.s32 8, %v207_v2  ;;  %v213_v7 = vsel %vm212_vm1, 8, %v211_v5  ;;  %408 = vmatpush3.bf16.msra.mxu0 %v423_v6  ;;  %v299_v18 = vld [vmem:[%s199_s23] sm:$0xf]  ;;  %s204_s27 = scalar_lea.vmem %s493_s3, %s404_s24 }
  0x10   : > { %v301_v20 = vunpack.c.l.bf16 %v299_v18  ;;  %v300_v23 = vld [vmem:[%s199_s23 + $0x4] sm:$0x1] }
  0x11   : > { %v217_v8 = vrot.slane %v213_v7, %v216_v3  ;;  %vm210_vm8 = vcmp.eq.s32.totalorder %v208_v4, 8  ;;  %v302_v28 = vunpack.c.l.bf16 %v300_v23 }
  0x13   : > { %vm218_vm2 = vcmp.eq.s32.totalorder %v207_v2, %v217_v8  ;;  %vm219_vm3 = vcmp.eq.s32.totalorder %v208_v4, %v217_v8 }
  0x14   : > { %v396_v9 = vsel %vm218_vm2, 1.0, %v436_v1  ;;  %v397_v10 = vsel %vm219_vm3, 1.0, %v436_v1 }
  0x15   : > { %v224_v11 = vpack.c.bf16 %v397_v10, %v396_v9  ;;  %v278_v12 = vsel %vm233_vm4, %v396_v9, 0.0  ;;  %v282_v13 = vsel %vm281_vm5, %v397_v10, 0.0 }
  0x16   : > { %279 = vadd.xlane.f32.xlu0 %v278_v12 }
  0x17   : > { %410 = vmatmul.mubr.msk.bf16.vlgmr.msra.gmra.mxu0 %vm233_vm4, %v224_v11 }
  0x1a   : > { %283 = vadd.xlane.f32.xlu0 %v282_v13 }
  0x9f   : > { %v280_v14 = vpop.xlane.xlu0 %279 }
  0xa0   : > { %vm291_vm6 = vcmp.eq.f32.partialorder %v280_v14, 0.0 }
  0xa1   : > { %v293_v16 = vsel %vm291_vm6, 1.0, %v280_v14 }
  0xa2   : > { %424 = vrcp.f32 %v293_v16 }
  0xa3   : > { %v284_v15 = vpop.xlane.xlu0 %283 }
  0xa4   : > { %vm292_vm7 = vcmp.eq.f32.partialorder %v284_v15, 0.0 }
  0xa5   : > { %v294_v17 = vsel %vm292_vm7, 1.0, %v284_v15 }
  0xa6   : > { %426 = vrcp.f32 %v294_v17 }
  0xaf   : > { %v425_v19 = vpop.eup %424 }
  0xb3   : > { %v427_v25 = vpop.eup %426 }
  0xd7   : > { %v271_v21 = vpop.f32.mrf.mxu0 }
  0xd8   : > { %v296_v22 = vmul.f32 %v425_v19, %v271_v21 }
  0xd9   : > { %v411_v24 = vpop.f32.mrf.mxu0 }
  0xda   : > { %vm303_vm9 = vcmp.eq.f32.partialorder %v296_v22, 0.0 }
  0xdb   : > { %v305_v26 = vsel %vm303_vm9, %v301_v20, %v296_v22  ;;  %v274_v27 = vpop.f32.mrf.mxu0 }
  0xdc   : > { %307 = vst [vmem:[%s204_s27] sm:$0xff] %v305_v26  ;;  %v290_v29 = vsel %vm210_vm8, 0.0, %v274_v27 }
  0xdd   : > { %v298_v30 = vmul.f32 %v427_v25, %v290_v29  ;;  %v412_v31 = vpop.f32.mrf.mxu0 }
  0xdf   : > { %vm304_vm10 = vcmp.eq.f32.partialorder %v298_v30, 0.0 }
  0xe0   : > { %v306_v32 = vsel %vm304_vm10, %v302_v28, %v298_v30 }
  0xe1   : > { %308 = vst [vmem:[%s204_s27 + $0x8] sm:$0x1] %v306_v32 }
  0xe2 PF: > { %s13_s12 = sadd.s32 1, %s434_s12  }
  0xe3   : > { %p10_p4 = scmp.ge.s32.totalorder %s13_s12, 6  }
  0xe5   :  { %12 = sbr.rel (!%p10_p4) target bundleno = 1 (0x1), region = 68 }

</bundles_post_ra>
